<compile_context>
chip_gen: v7x
topology: tpu7x:2x2x1
jax: 0.10.0
libtpu: 0.0.40
codegen_flags: <defaults>
</compile_context>

<pallas_src>
import math

import jax
import jax.numpy as jnp
from jax.experimental import pallas as pl
from jax.experimental.pallas import tpu as pltpu


def make_mha_kernel(num_heads: int, head_dim: int, eps: float = 1e-6,
                    mm_dtype=jnp.float32):
    """Kernel factory.  One grid step processes a (Bt, N, E) slab of the batch."""
    scale = 1.0 / math.sqrt(head_dim)

    def kernel(q_ref, k_ref, v_ref,
               wq_ref, bq_ref, wk_ref, bk_ref, wv_ref, bv_ref,
               wo_ref, bo_ref, gamma_ref, beta_ref,
               out_ref, attn_ref):
        bt, nq, e = q_ref.shape
        _, nk, _ = k_ref.shape

        # Fold the batch into the M dimension of every projection matmul.
        # (Bt, N, E) -> (Bt*N, E) only merges leading dims (no relayout).
        q2 = q_ref[...].reshape(bt * nq, e)
        k2 = k_ref[...].reshape(bt * nk, e)
        v2 = v_ref[...].reshape(bt * nk, e)

        # Output-projection accumulator (f32): sum_h o_h @ Wo_h == concat(o_h) @ Wo,
        # so the heads never have to be concatenated along the lane dim.
        y = jnp.zeros((bt * nq, e), jnp.float32)

        # TODO(synk): v1 = self.v_proj1(v) is computed in the PyTorch forward but
        # never used downstream, so it is intentionally omitted (no output effect).

        # Static, small head loop.  Weights are head-stacked, so each iteration is
        # clean MXU work: projections contract over E (full embedding), and the
        # score / PV matmuls are batched einsums over the folded batch dim that
        # contract the last dims directly (no `.T`, no lane sub-slicing).
        for h in range(num_heads):
            qh = jnp.dot(q2, wq_ref[h], preferred_element_type=jnp.float32) + bq_ref[h]
            kh = jnp.dot(k2, wk_ref[h], preferred_element_type=jnp.float32) + bk_ref[h]
            vh = jnp.dot(v2, wv_ref[h], preferred_element_type=jnp.float32) + bv_ref[h]

            qh = (qh * scale).reshape(bt, nq, head_dim).astype(mm_dtype)
            kh = kh.reshape(bt, nk, head_dim).astype(mm_dtype)
            vh = vh.reshape(bt, nk, head_dim).astype(mm_dtype)

            # (Bt, Nq, Dh) x (Bt, Nk, Dh) -> (Bt, Nq, Nk), contracting last dims.
            s = jnp.einsum("bqd,bkd->bqk", qh, kh,
                           preferred_element_type=jnp.float32)
            # Pre-softmax scores.  attn output is head-major so this is a plain
            # leading-index store.
            attn_ref[h] = s

            # Softmax in f32.  EUP reciprocal + one Newton step (VPU muls only)
            # instead of a VPU divide.
            m = jnp.max(s, axis=-1, keepdims=True)
            p = jnp.exp(s - m)
            denom = jnp.sum(p, axis=-1, keepdims=True)
            inv = pl.reciprocal(denom, approx=True)
            inv = inv * (2.0 - denom * inv)      # Newton refine -> ~f32 accuracy
            p = p * inv

            # (Bt, Nq, Nk) x (Bt, Nk, Dh) -> (Bt, Nq, Dh)
            o = jnp.einsum("bqk,bkd->bqd", p.astype(mm_dtype), vh,
                           preferred_element_type=jnp.float32)

            # Per-head slice of the output projection, accumulated into y.
            y = y + jnp.dot(o.reshape(bt * nq, head_dim).astype(mm_dtype),
                            wo_ref[h], preferred_element_type=jnp.float32)

        # Output-projection bias + LayerNorm(eps) + affine, all in f32.
        y = y + bo_ref[...]
        mu = jnp.mean(y, axis=-1, keepdims=True)
        var = jnp.mean((y - mu) ** 2, axis=-1, keepdims=True)
        yn = (y - mu) * jax.lax.rsqrt(var + eps)
        out_ref[...] = (yn * gamma_ref[...] + beta_ref[...]).reshape(bt, nq, e)

    return kernel


def multi_head_attention2(q, k, v, params, num_heads, *,
                          batch_block=None, use_bf16=False, eps=1e-6):
    """Returns (out1[0], attn_out[0]) exactly like the PyTorch forward."""
    B, Nq, E = q.shape
    _, Nk, _ = k.shape
    internal_dim = params["wq"].shape[0]
    assert internal_dim % num_heads == 0
    Dh = internal_dim // num_heads

    # Whole batch per grid step by default (amortizes per-step overhead at these
    # sizes).  For large B*N pass batch_block to tile the batch; the grid axis is
    # "parallel", so on v7x the two TensorCores split the batch blocks.  For very
    # large N an additional Nq grid axis (and vmem_limit_bytes) would be needed to
    # stay inside v7x's 64 MiB VMEM.
    bt = B if batch_block is None else batch_block
    assert B % bt == 0, "batch_block must divide B"
    nb = B // bt

    mm_dtype = jnp.bfloat16 if use_bf16 else jnp.float32

    # Pre-transpose + head-stack the weights ONCE here so the kernel never
    # materializes a transpose:
    #   wq/wk/wv: torch (ID, E) -> (H, E, Dh) with w_h[h] == w[h*Dh:(h+1)*Dh, :].T
    #   wo:       torch (E, ID) -> (H, Dh, E) with wo_h[h] == wo.T[h*Dh:(h+1)*Dh, :]
    def stack_in_proj(w):
        return jnp.transpose(w.reshape(num_heads, Dh, E), (0, 2, 1)).astype(mm_dtype)

    def stack_bias(b):
        return b.reshape(num_heads, 1, Dh).astype(jnp.float32)

    wq_h, bq_h = stack_in_proj(params["wq"]), stack_bias(params["bq"])
    wk_h, bk_h = stack_in_proj(params["wk"]), stack_bias(params["bk"])
    wv_h, bv_h = stack_in_proj(params["wv"]), stack_bias(params["bv"])
    wo_h = jnp.transpose(params["wo"]).reshape(num_heads, Dh, E).astype(mm_dtype)
    bo = params["bo"].astype(jnp.float32)
    gamma = params["gamma"].astype(jnp.float32)
    beta = params["beta"].astype(jnp.float32)

    qx, kx, vx = (x.astype(mm_dtype) for x in (q, k, v))

    def const_spec(shape):
        nd = len(shape)
        return pl.BlockSpec(shape, lambda b: (0,) * nd)

    in_specs = [
        pl.BlockSpec((bt, Nq, E), lambda b: (b, 0, 0)),          # q
        pl.BlockSpec((bt, Nk, E), lambda b: (b, 0, 0)),          # k
        pl.BlockSpec((bt, Nk, E), lambda b: (b, 0, 0)),          # v
        # Grid-invariant weights/biases: constant index_map -> Pallas skips the
        # re-DMA between grid steps.  For production-size weights on v7x, single-
        # buffer these (pipeline_mode=pl.Buffered(1)) to halve their VMEM footprint.
        const_spec((num_heads, E, Dh)), const_spec((num_heads, 1, Dh)),   # q_proj
        const_spec((num_heads, E, Dh)), const_spec((num_heads, 1, Dh)),   # k_proj
        const_spec((num_heads, E, Dh)), const_spec((num_heads, 1, Dh)),   # v_proj
        const_spec((num_heads, Dh, E)), const_spec((1, E)),               # out_proj
        const_spec((1, E)), const_spec((1, E)),                           # LN gamma, beta
    ]
    # attn scores are emitted head-major (H, B, Nq, Nk) so each head's write is a
    # plain leading-index store; the wrapper transposes back (the caller only
    # consumes batch 0, so XLA reduces this to a slice).
    # NOTE: with production shapes (E >= 128, Nk >= 128) both outputs are already
    # lane-dense; at the <128-lane toy dims here we keep the natural layout since
    # flattening (Nq, Nk) -> (Nq*Nk,) inside the kernel would trade a masked store
    # for a sublane->lane relayout of comparable cost.
    out_specs = (
        pl.BlockSpec((bt, Nq, E), lambda b: (b, 0, 0)),
        pl.BlockSpec((num_heads, bt, Nq, Nk), lambda b: (0, b, 0, 0)),
    )
    out_shape = (
        jax.ShapeDtypeStruct((B, Nq, E), jnp.float32),
        jax.ShapeDtypeStruct((num_heads, B, Nq, Nk), jnp.float32),
    )

    out1, attn_hm = pl.pallas_call(
        make_mha_kernel(num_heads, Dh, eps=eps, mm_dtype=mm_dtype),
        grid=(nb,),
        in_specs=in_specs,
        out_specs=out_specs,
        out_shape=out_shape,
        compiler_params=pltpu.CompilerParams(
            dimension_semantics=("parallel",),   # independent batch blocks
        ),
    )(qx, kx, vx,
      wq_h, bq_h, wk_h, bk_h, wv_h, bv_h, wo_h, bo, gamma, beta)

    attn_out = jnp.transpose(attn_hm, (1, 0, 2, 3))   # (B, H, Nq, Nk)
    return out1[0], attn_out[0]


def reference_forward(q, k, v, params, num_heads):
    """Pure-JAX mirror of the PyTorch forward, for correctness checking."""
    def lin(x, w, b):
        return x @ w.T + b[0]

    qp = lin(q, params["wq"], params["bq"])
    kp = lin(k, params["wk"], params["bk"])
    vp = lin(v, params["wv"], params["bv"])

    def sep(x):
        b, n, c = x.shape
        return x.reshape(b, n, num_heads, c // num_heads).transpose(0, 2, 1, 3)

    qh, kh, vh = sep(qp), sep(kp), sep(vp)
    dh = qh.shape[-1]
    attn = jnp.einsum("bhqd,bhkd->bhqk", qh, kh) / math.sqrt(dh)
    attn_out = attn
    p = jax.nn.softmax(attn, axis=-1)
    o = jnp.einsum("bhqk,bhkd->bhqd", p, vh)
    o = o.transpose(0, 2, 1, 3).reshape(q.shape[0], q.shape[1], -1)
    y = lin(o, params["wo"], params["bo"])
    mu = y.mean(-1, keepdims=True)
    var = ((y - mu) ** 2).mean(-1, keepdims=True)
    yn = (y - mu) / jnp.sqrt(var + 1e-6)
    out1 = yn * params["gamma"][0] + params["beta"][0]
    return out1[0], attn_out[0]


if __name__ == "__main__":
    # Small, module-consistent shapes.
    B, Nq, Nk = 2, 8, 16
    embedding_dim, num_heads, downsample_rate = 32, 2, 1
    internal_dim = embedding_dim // downsample_rate

    key = jax.random.PRNGKey(0)
    keys = jax.random.split(key, 12)

    q = jax.random.normal(keys[0], (B, Nq, embedding_dim), dtype=jnp.float32)
    k = jax.random.normal(keys[1], (B, Nk, embedding_dim), dtype=jnp.float32)
    v = jax.random.normal(keys[2], (B, Nk, embedding_dim), dtype=jnp.float32)

    def init_linear(kw, kb, out_f, in_f):
        lim = 1.0 / math.sqrt(in_f)
        w = jax.random.uniform(kw, (out_f, in_f), jnp.float32, -lim, lim)
        b = jax.random.uniform(kb, (1, out_f), jnp.float32, -lim, lim)
        return w, b

    wq, bq = init_linear(keys[3], keys[4], internal_dim, embedding_dim)
    wk, bk = init_linear(keys[5], keys[6], internal_dim, embedding_dim)
    wv, bv = init_linear(keys[7], keys[8], internal_dim, embedding_dim)
    wo, bo = init_linear(keys[9], keys[10], embedding_dim, internal_dim)
    params = dict(
        wq=wq, bq=bq, wk=wk, bk=bk, wv=wv, bv=bv, wo=wo, bo=bo,
        gamma=jnp.ones((1, embedding_dim), jnp.float32),
        beta=jnp.zeros((1, embedding_dim), jnp.float32),
    )

    ref_out1, ref_attn = reference_forward(q, k, v, params, num_heads)

    # f32 path (exact parity with the PyTorch module).
    out1, attn_out = multi_head_attention2(q, k, v, params, num_heads)
    out1 = jax.block_until_ready(out1)
    attn_out = jax.block_until_ready(attn_out)
    assert jnp.allclose(out1, ref_out1, atol=5e-4, rtol=5e-4), "out1 mismatch (f32)"
    assert jnp.allclose(attn_out, ref_attn, atol=5e-4, rtol=5e-4), "attn mismatch (f32)"

    # bf16 MXU-operand path (v6e/v7x): softmax/LayerNorm/accumulation stay in f32.
    out1_bf, attn_bf = multi_head_attention2(q, k, v, params, num_heads, use_bf16=True)
    out1_bf = jax.block_until_ready(out1_bf)
    attn_bf = jax.block_until_ready(attn_bf)
    assert jnp.allclose(out1_bf, ref_out1, atol=1.5e-1, rtol=1.5e-1), "out1 mismatch (bf16)"
    assert jnp.allclose(attn_bf, ref_attn, atol=1.5e-1, rtol=1.5e-1), "attn mismatch (bf16)"

    print("KERNEL_OK")
</pallas_src>

<mosaic_0001>
module attributes {stable_mosaic.version = 11 : i64} {
  func.func @kernel(%arg0: i32, %arg1: memref<2x8x32xf32, #tpu.memory_space<vmem>>, %arg2: memref<2x16x32xf32, #tpu.memory_space<vmem>>, %arg3: memref<2x16x32xf32, #tpu.memory_space<vmem>>, %arg4: memref<2x32x16xf32, #tpu.memory_space<vmem>>, %arg5: memref<2x1x16xf32, #tpu.memory_space<vmem>>, %arg6: memref<2x32x16xf32, #tpu.memory_space<vmem>>, %arg7: memref<2x1x16xf32, #tpu.memory_space<vmem>>, %arg8: memref<2x32x16xf32, #tpu.memory_space<vmem>>, %arg9: memref<2x1x16xf32, #tpu.memory_space<vmem>>, %arg10: memref<2x16x32xf32, #tpu.memory_space<vmem>>, %arg11: memref<1x32xf32, #tpu.memory_space<vmem>>, %arg12: memref<1x32xf32, #tpu.memory_space<vmem>>, %arg13: memref<1x32xf32, #tpu.memory_space<vmem>>, %arg14: memref<2x8x32xf32, #tpu.memory_space<vmem>>, %arg15: memref<2x2x8x16xf32, #tpu.memory_space<vmem>>) attributes {dimension_semantics = [#tpu.dimension_semantics<parallel>], iteration_bounds = array<i64: 1>, scalar_prefetch = 0 : i64, scratch_operands = 0 : i64, tpu.core_type = #tpu.core_type<tc>, window_params = [{transform_indices = @transform_0, window_bounds = array<i64: 2, 8, 32>}, {transform_indices = @transform_1, window_bounds = array<i64: 2, 16, 32>}, {transform_indices = @transform_2, window_bounds = array<i64: 2, 16, 32>}, {pipeline_mode = #tpu.pipeline_mode<synchronous>, transform_indices = @transform_3, window_bounds = array<i64: 2, 32, 16>}, {pipeline_mode = #tpu.pipeline_mode<synchronous>, transform_indices = @transform_4, window_bounds = array<i64: 2, 1, 16>}, {pipeline_mode = #tpu.pipeline_mode<synchronous>, transform_indices = @transform_5, window_bounds = array<i64: 2, 32, 16>}, {pipeline_mode = #tpu.pipeline_mode<synchronous>, transform_indices = @transform_6, window_bounds = array<i64: 2, 1, 16>}, {pipeline_mode = #tpu.pipeline_mode<synchronous>, transform_indices = @transform_7, window_bounds = array<i64: 2, 32, 16>}, {pipeline_mode = #tpu.pipeline_mode<synchronous>, transform_indices = @transform_8, window_bounds = array<i64: 2, 1, 16>}, {pipeline_mode = #tpu.pipeline_mode<synchronous>, transform_indices = @transform_9, window_bounds = array<i64: 2, 16, 32>}, {pipeline_mode = #tpu.pipeline_mode<synchronous>, transform_indices = @transform_10, window_bounds = array<i64: 1, 32>}, {pipeline_mode = #tpu.pipeline_mode<synchronous>, transform_indices = @transform_11, window_bounds = array<i64: 1, 32>}, {pipeline_mode = #tpu.pipeline_mode<synchronous>, transform_indices = @transform_12, window_bounds = array<i64: 1, 32>}, {transform_indices = @transform_13, window_bounds = array<i64: 2, 8, 32>}, {transform_indices = @transform_14, window_bounds = array<i64: 2, 2, 8, 16>}]} {
    %c0 = arith.constant 0 : index
    %c0_0 = arith.constant 0 : index
    %c0_1 = arith.constant 0 : index
    %0 = vector.load %arg1[%c0, %c0_0, %c0_1] : memref<2x8x32xf32, #tpu.memory_space<vmem>>, vector<2x8x32xf32>
    %1 = vector.shape_cast %0 : vector<2x8x32xf32> to vector<16x32xf32>
    %c0_2 = arith.constant 0 : index
    %c0_3 = arith.constant 0 : index
    %c0_4 = arith.constant 0 : index
    %2 = vector.load %arg2[%c0_2, %c0_3, %c0_4] : memref<2x16x32xf32, #tpu.memory_space<vmem>>, vector<2x16x32xf32>
    %3 = vector.shape_cast %2 : vector<2x16x32xf32> to vector<32x32xf32>
    %c0_5 = arith.constant 0 : index
    %c0_6 = arith.constant 0 : index
    %c0_7 = arith.constant 0 : index
    %4 = vector.load %arg3[%c0_5, %c0_6, %c0_7] : memref<2x16x32xf32, #tpu.memory_space<vmem>>, vector<2x16x32xf32>
    %5 = vector.shape_cast %4 : vector<2x16x32xf32> to vector<32x32xf32>
    %cst = arith.constant 0.000000e+00 : f32
    %6 = vector.broadcast %cst : f32 to vector<16x32xf32>
    %c0_8 = arith.constant 0 : index
    %c0_9 = arith.constant 0 : index
    %c0_10 = arith.constant 0 : index
    %7 = vector.load %arg4[%c0_8, %c0_9, %c0_10] : memref<2x32x16xf32, #tpu.memory_space<vmem>>, vector<1x32x16xf32>
    %8 = vector.shape_cast %7 : vector<1x32x16xf32> to vector<32x16xf32>
    %cst_11 = arith.constant dense<0.000000e+00> : vector<16x16xf32>
    %9 = tpu.matmul %1, %8, %cst_11 {dimension_numbers = #tpu.dot_dimension_numbers<[1], [0], [0], [1], [0, 0, 1, 1], [], []>} : vector<16x32xf32>, vector<32x16xf32>, vector<16x16xf32> -> vector<16x16xf32>
    %c0_12 = arith.constant 0 : index
    %c0_13 = arith.constant 0 : index
    %c0_14 = arith.constant 0 : index
    %10 = vector.load %arg5[%c0_12, %c0_13, %c0_14] : memref<2x1x16xf32, #tpu.memory_space<vmem>>, vector<1x1x16xf32>
    %11 = vector.shape_cast %10 : vector<1x1x16xf32> to vector<1x16xf32>
    %12 = vector.broadcast %11 : vector<1x16xf32> to vector<16x16xf32>
    %13 = arith.addf %9, %12 : vector<16x16xf32>
    %c0_15 = arith.constant 0 : index
    %c0_16 = arith.constant 0 : index
    %c0_17 = arith.constant 0 : index
    %14 = vector.load %arg6[%c0_15, %c0_16, %c0_17] : memref<2x32x16xf32, #tpu.memory_space<vmem>>, vector<1x32x16xf32>
    %15 = vector.shape_cast %14 : vector<1x32x16xf32> to vector<32x16xf32>
    %cst_18 = arith.constant dense<0.000000e+00> : vector<32x16xf32>
    %16 = tpu.matmul %3, %15, %cst_18 {dimension_numbers = #tpu.dot_dimension_numbers<[1], [0], [0], [1], [0, 0, 1, 1], [], []>} : vector<32x32xf32>, vector<32x16xf32>, vector<32x16xf32> -> vector<32x16xf32>
    %c0_19 = arith.constant 0 : index
    %c0_20 = arith.constant 0 : index
    %c0_21 = arith.constant 0 : index
    %17 = vector.load %arg7[%c0_19, %c0_20, %c0_21] : memref<2x1x16xf32, #tpu.memory_space<vmem>>, vector<1x1x16xf32>
    %18 = vector.shape_cast %17 : vector<1x1x16xf32> to vector<1x16xf32>
    %19 = vector.broadcast %18 : vector<1x16xf32> to vector<32x16xf32>
    %20 = arith.addf %16, %19 : vector<32x16xf32>
    %c0_22 = arith.constant 0 : index
    %c0_23 = arith.constant 0 : index
    %c0_24 = arith.constant 0 : index
    %21 = vector.load %arg8[%c0_22, %c0_23, %c0_24] : memref<2x32x16xf32, #tpu.memory_space<vmem>>, vector<1x32x16xf32>
    %22 = vector.shape_cast %21 : vector<1x32x16xf32> to vector<32x16xf32>
    %cst_25 = arith.constant dense<0.000000e+00> : vector<32x16xf32>
    %23 = tpu.matmul %5, %22, %cst_25 {dimension_numbers = #tpu.dot_dimension_numbers<[1], [0], [0], [1], [0, 0, 1, 1], [], []>} : vector<32x32xf32>, vector<32x16xf32>, vector<32x16xf32> -> vector<32x16xf32>
    %c0_26 = arith.constant 0 : index
    %c0_27 = arith.constant 0 : index
    %c0_28 = arith.constant 0 : index
    %24 = vector.load %arg9[%c0_26, %c0_27, %c0_28] : memref<2x1x16xf32, #tpu.memory_space<vmem>>, vector<1x1x16xf32>
    %25 = vector.shape_cast %24 : vector<1x1x16xf32> to vector<1x16xf32>
    %26 = vector.broadcast %25 : vector<1x16xf32> to vector<32x16xf32>
    %27 = arith.addf %23, %26 : vector<32x16xf32>
    %cst_29 = arith.constant 2.500000e-01 : f32
    %28 = vector.broadcast %cst_29 : f32 to vector<16x16xf32>
    %29 = arith.mulf %13, %28 : vector<16x16xf32>
    %30 = vector.shape_cast %29 : vector<16x16xf32> to vector<2x8x16xf32>
    %31 = vector.shape_cast %20 : vector<32x16xf32> to vector<2x16x16xf32>
    %32 = vector.shape_cast %27 : vector<32x16xf32> to vector<2x16x16xf32>
    "tpu.trace_start"() <{level = 10 : i32, message = "bqd,bkd->bqk"}> : () -> ()
    %cst_30 = arith.constant dense<0.000000e+00> : vector<2x8x16xf32>
    %33 = tpu.matmul %30, %31, %cst_30 {dimension_numbers = #tpu.dot_dimension_numbers<[2], [2], [1], [1], [0, 0, 0, 1, 1, 1], [0], [0]>} : vector<2x8x16xf32>, vector<2x16x16xf32>, vector<2x8x16xf32> -> vector<2x8x16xf32>
    "tpu.trace_stop"() : () -> ()
    %c0_31 = arith.constant 0 : index
    %c0_32 = arith.constant 0 : index
    %c0_33 = arith.constant 0 : index
    %c0_34 = arith.constant 0 : index
    %34 = vector.load %arg15[%c0_31, %c0_32, %c0_33, %c0_34] : memref<2x2x8x16xf32, #tpu.memory_space<vmem>>, vector<1x2x8x16xf32>
    %35 = vector.shape_cast %34 : vector<1x2x8x16xf32> to vector<2x8x16xf32>
    %36 = vector.shape_cast %33 : vector<2x8x16xf32> to vector<1x2x8x16xf32>
    tpu.vector_store %arg15[%c0_31, %c0_32, %c0_33, %c0_34], %36 {strides = array<i32>} : memref<2x2x8x16xf32, #tpu.memory_space<vmem>>, vector<1x2x8x16xf32>,
    %cst_35 = arith.constant dense<0xFF800000> : vector<2x8xf32>
    %37 = vector.multi_reduction <maximumf>, %33, %cst_35 [2] : vector<2x8x16xf32> to vector<2x8xf32>
    %38 = vector.shape_cast %37 : vector<2x8xf32> to vector<2x8x1xf32>
    %39 = vector.broadcast %38 : vector<2x8x1xf32> to vector<2x8x16xf32>
    %40 = arith.subf %33, %39 : vector<2x8x16xf32>
    %41 = math.exp %40 : vector<2x8x16xf32>
    %cst_36 = arith.constant dense<0.000000e+00> : vector<2x8xf32>
    %42 = vector.multi_reduction <add>, %41, %cst_36 [2] : vector<2x8x16xf32> to vector<2x8xf32>
    %43 = vector.shape_cast %42 : vector<2x8xf32> to vector<2x8x1xf32>
    %44 = tpu.reciprocal %43 {approx = true} : vector<2x8x1xf32> -> vector<2x8x1xf32>
    %45 = arith.mulf %43, %44 : vector<2x8x1xf32>
    %cst_37 = arith.constant 2.000000e+00 : f32
    %46 = vector.broadcast %cst_37 : f32 to vector<2x8x1xf32>
    %47 = arith.subf %46, %45 : vector<2x8x1xf32>
    %48 = arith.mulf %44, %47 : vector<2x8x1xf32>
    %49 = vector.broadcast %48 : vector<2x8x1xf32> to vector<2x8x16xf32>
    %50 = arith.mulf %41, %49 : vector<2x8x16xf32>
    "tpu.trace_start"() <{level = 10 : i32, message = "bqk,bkd->bqd"}> : () -> ()
    %cst_38 = arith.constant dense<0.000000e+00> : vector<2x8x16xf32>
    %51 = tpu.matmul %50, %32, %cst_38 {dimension_numbers = #tpu.dot_dimension_numbers<[2], [1], [1], [2], [0, 0, 0, 1, 1, 2], [0], [0]>} : vector<2x8x16xf32>, vector<2x16x16xf32>, vector<2x8x16xf32> -> vector<2x8x16xf32>
    "tpu.trace_stop"() : () -> ()
    %52 = vector.shape_cast %51 : vector<2x8x16xf32> to vector<16x16xf32>
    %c0_39 = arith.constant 0 : index
    %c0_40 = arith.constant 0 : index
    %c0_41 = arith.constant 0 : index
    %53 = vector.load %arg10[%c0_39, %c0_40, %c0_41] : memref<2x16x32xf32, #tpu.memory_space<vmem>>, vector<1x16x32xf32>
    %54 = vector.shape_cast %53 : vector<1x16x32xf32> to vector<16x32xf32>
    %cst_42 = arith.constant dense<0.000000e+00> : vector<16x32xf32>
    %55 = tpu.matmul %52, %54, %cst_42 {dimension_numbers = #tpu.dot_dimension_numbers<[1], [0], [0], [1], [0, 0, 1, 1], [], []>} : vector<16x16xf32>, vector<16x32xf32>, vector<16x32xf32> -> vector<16x32xf32>
    %56 = arith.addf %6, %55 : vector<16x32xf32>
    %c1 = arith.constant 1 : index
    %c0_43 = arith.constant 0 : index
    %c0_44 = arith.constant 0 : index
    %57 = vector.load %arg4[%c1, %c0_43, %c0_44] : memref<2x32x16xf32, #tpu.memory_space<vmem>>, vector<1x32x16xf32>
    %58 = vector.shape_cast %57 : vector<1x32x16xf32> to vector<32x16xf32>
    %cst_45 = arith.constant dense<0.000000e+00> : vector<16x16xf32>
    %59 = tpu.matmul %1, %58, %cst_45 {dimension_numbers = #tpu.dot_dimension_numbers<[1], [0], [0], [1], [0, 0, 1, 1], [], []>} : vector<16x32xf32>, vector<32x16xf32>, vector<16x16xf32> -> vector<16x16xf32>
    %c1_46 = arith.constant 1 : index
    %c0_47 = arith.constant 0 : index
    %c0_48 = arith.constant 0 : index
    %60 = vector.load %arg5[%c1_46, %c0_47, %c0_48] : memref<2x1x16xf32, #tpu.memory_space<vmem>>, vector<1x1x16xf32>
    %61 = vector.shape_cast %60 : vector<1x1x16xf32> to vector<1x16xf32>
    %62 = vector.broadcast %61 : vector<1x16xf32> to vector<16x16xf32>
    %63 = arith.addf %59, %62 : vector<16x16xf32>
    %c1_49 = arith.constant 1 : index
    %c0_50 = arith.constant 0 : index
    %c0_51 = arith.constant 0 : index
    %64 = vector.load %arg6[%c1_49, %c0_50, %c0_51] : memref<2x32x16xf32, #tpu.memory_space<vmem>>, vector<1x32x16xf32>
    %65 = vector.shape_cast %64 : vector<1x32x16xf32> to vector<32x16xf32>
    %cst_52 = arith.constant dense<0.000000e+00> : vector<32x16xf32>
    %66 = tpu.matmul %3, %65, %cst_52 {dimension_numbers = #tpu.dot_dimension_numbers<[1], [0], [0], [1], [0, 0, 1, 1], [], []>} : vector<32x32xf32>, vector<32x16xf32>, vector<32x16xf32> -> vector<32x16xf32>
    %c1_53 = arith.constant 1 : index
    %c0_54 = arith.constant 0 : index
    %c0_55 = arith.constant 0 : index
    %67 = vector.load %arg7[%c1_53, %c0_54, %c0_55] : memref<2x1x16xf32, #tpu.memory_space<vmem>>, vector<1x1x16xf32>
    %68 = vector.shape_cast %67 : vector<1x1x16xf32> to vector<1x16xf32>
    %69 = vector.broadcast %68 : vector<1x16xf32> to vector<32x16xf32>
    %70 = arith.addf %66, %69 : vector<32x16xf32>
    %c1_56 = arith.constant 1 : index
    %c0_57 = arith.constant 0 : index
    %c0_58 = arith.constant 0 : index
    %71 = vector.load %arg8[%c1_56, %c0_57, %c0_58] : memref<2x32x16xf32, #tpu.memory_space<vmem>>, vector<1x32x16xf32>
    %72 = vector.shape_cast %71 : vector<1x32x16xf32> to vector<32x16xf32>
    %cst_59 = arith.constant dense<0.000000e+00> : vector<32x16xf32>
    %73 = tpu.matmul %5, %72, %cst_59 {dimension_numbers = #tpu.dot_dimension_numbers<[1], [0], [0], [1], [0, 0, 1, 1], [], []>} : vector<32x32xf32>, vector<32x16xf32>, vector<32x16xf32> -> vector<32x16xf32>
    %c1_60 = arith.constant 1 : index
    %c0_61 = arith.constant 0 : index
    %c0_62 = arith.constant 0 : index
    %74 = vector.load %arg9[%c1_60, %c0_61, %c0_62] : memref<2x1x16xf32, #tpu.memory_space<vmem>>, vector<1x1x16xf32>
    %75 = vector.shape_cast %74 : vector<1x1x16xf32> to vector<1x16xf32>
    %76 = vector.broadcast %75 : vector<1x16xf32> to vector<32x16xf32>
    %77 = arith.addf %73, %76 : vector<32x16xf32>
    %cst_63 = arith.constant 2.500000e-01 : f32
    %78 = vector.broadcast %cst_63 : f32 to vector<16x16xf32>
    %79 = arith.mulf %63, %78 : vector<16x16xf32>
    %80 = vector.shape_cast %79 : vector<16x16xf32> to vector<2x8x16xf32>
    %81 = vector.shape_cast %70 : vector<32x16xf32> to vector<2x16x16xf32>
    %82 = vector.shape_cast %77 : vector<32x16xf32> to vector<2x16x16xf32>
    "tpu.trace_start"() <{level = 10 : i32, message = "bqd,bkd->bqk"}> : () -> ()
    %cst_64 = arith.constant dense<0.000000e+00> : vector<2x8x16xf32>
    %83 = tpu.matmul %80, %81, %cst_64 {dimension_numbers = #tpu.dot_dimension_numbers<[2], [2], [1], [1], [0, 0, 0, 1, 1, 1], [0], [0]>} : vector<2x8x16xf32>, vector<2x16x16xf32>, vector<2x8x16xf32> -> vector<2x8x16xf32>
    "tpu.trace_stop"() : () -> ()
    %c1_65 = arith.constant 1 : index
    %c0_66 = arith.constant 0 : index
    %c0_67 = arith.constant 0 : index
    %c0_68 = arith.constant 0 : index
    %84 = vector.load %arg15[%c1_65, %c0_66, %c0_67, %c0_68] : memref<2x2x8x16xf32, #tpu.memory_space<vmem>>, vector<1x2x8x16xf32>
    %85 = vector.shape_cast %84 : vector<1x2x8x16xf32> to vector<2x8x16xf32>
    %86 = vector.shape_cast %83 : vector<2x8x16xf32> to vector<1x2x8x16xf32>
    tpu.vector_store %arg15[%c1_65, %c0_66, %c0_67, %c0_68], %86 {strides = array<i32>} : memref<2x2x8x16xf32, #tpu.memory_space<vmem>>, vector<1x2x8x16xf32>,
    %cst_69 = arith.constant dense<0xFF800000> : vector<2x8xf32>
    %87 = vector.multi_reduction <maximumf>, %83, %cst_69 [2] : vector<2x8x16xf32> to vector<2x8xf32>
    %88 = vector.shape_cast %87 : vector<2x8xf32> to vector<2x8x1xf32>
    %89 = vector.broadcast %88 : vector<2x8x1xf32> to vector<2x8x16xf32>
    %90 = arith.subf %83, %89 : vector<2x8x16xf32>
    %91 = math.exp %90 : vector<2x8x16xf32>
    %cst_70 = arith.constant dense<0.000000e+00> : vector<2x8xf32>
    %92 = vector.multi_reduction <add>, %91, %cst_70 [2] : vector<2x8x16xf32> to vector<2x8xf32>
    %93 = vector.shape_cast %92 : vector<2x8xf32> to vector<2x8x1xf32>
    %94 = tpu.reciprocal %93 {approx = true} : vector<2x8x1xf32> -> vector<2x8x1xf32>
    %95 = arith.mulf %93, %94 : vector<2x8x1xf32>
    %cst_71 = arith.constant 2.000000e+00 : f32
    %96 = vector.broadcast %cst_71 : f32 to vector<2x8x1xf32>
    %97 = arith.subf %96, %95 : vector<2x8x1xf32>
    %98 = arith.mulf %94, %97 : vector<2x8x1xf32>
    %99 = vector.broadcast %98 : vector<2x8x1xf32> to vector<2x8x16xf32>
    %100 = arith.mulf %91, %99 : vector<2x8x16xf32>
    "tpu.trace_start"() <{level = 10 : i32, message = "bqk,bkd->bqd"}> : () -> ()
    %cst_72 = arith.constant dense<0.000000e+00> : vector<2x8x16xf32>
    %101 = tpu.matmul %100, %82, %cst_72 {dimension_numbers = #tpu.dot_dimension_numbers<[2], [1], [1], [2], [0, 0, 0, 1, 1, 2], [0], [0]>} : vector<2x8x16xf32>, vector<2x16x16xf32>, vector<2x8x16xf32> -> vector<2x8x16xf32>
    "tpu.trace_stop"() : () -> ()
    %102 = vector.shape_cast %101 : vector<2x8x16xf32> to vector<16x16xf32>
    %c1_73 = arith.constant 1 : index
    %c0_74 = arith.constant 0 : index
    %c0_75 = arith.constant 0 : index
    %103 = vector.load %arg10[%c1_73, %c0_74, %c0_75] : memref<2x16x32xf32, #tpu.memory_space<vmem>>, vector<1x16x32xf32>
    %104 = vector.shape_cast %103 : vector<1x16x32xf32> to vector<16x32xf32>
    %cst_76 = arith.constant dense<0.000000e+00> : vector<16x32xf32>
    %105 = tpu.matmul %102, %104, %cst_76 {dimension_numbers = #tpu.dot_dimension_numbers<[1], [0], [0], [1], [0, 0, 1, 1], [], []>} : vector<16x16xf32>, vector<16x32xf32>, vector<16x32xf32> -> vector<16x32xf32>
    %106 = arith.addf %56, %105 : vector<16x32xf32>
    %c0_77 = arith.constant 0 : index
    %c0_78 = arith.constant 0 : index
    %107 = vector.load %arg11[%c0_77, %c0_78] : memref<1x32xf32, #tpu.memory_space<vmem>>, vector<1x32xf32>
    %108 = vector.broadcast %107 : vector<1x32xf32> to vector<16x32xf32>
    %109 = arith.addf %106, %108 : vector<16x32xf32>
    %cst_79 = arith.constant dense<0.000000e+00> : vector<16xf32>
    %110 = vector.multi_reduction <add>, %109, %cst_79 [1] : vector<16x32xf32> to vector<16xf32>
    %111 = vector.shape_cast %110 : vector<16xf32> to vector<16x1xf32>
    %cst_80 = arith.constant 3.200000e+01 : f32
    %112 = vector.broadcast %cst_80 : f32 to vector<16x1xf32>
    %113 = arith.divf %111, %112 : vector<16x1xf32>
    %114 = vector.broadcast %113 : vector<16x1xf32> to vector<16x32xf32>
    %115 = arith.subf %109, %114 : vector<16x32xf32>
    %116 = arith.mulf %115, %115 : vector<16x32xf32>
    %cst_81 = arith.constant dense<0.000000e+00> : vector<16xf32>
    %117 = vector.multi_reduction <add>, %116, %cst_81 [1] : vector<16x32xf32> to vector<16xf32>
    %118 = vector.shape_cast %117 : vector<16xf32> to vector<16x1xf32>
    %cst_82 = arith.constant 3.200000e+01 : f32
    %119 = vector.broadcast %cst_82 : f32 to vector<16x1xf32>
    %120 = arith.divf %118, %119 : vector<16x1xf32>
    %121 = vector.broadcast %113 : vector<16x1xf32> to vector<16x32xf32>
    %122 = arith.subf %109, %121 : vector<16x32xf32>
    %cst_83 = arith.constant 9.99999997E-7 : f32
    %123 = vector.broadcast %cst_83 : f32 to vector<16x1xf32>
    %124 = arith.addf %120, %123 : vector<16x1xf32>
    %125 = math.rsqrt %124 : vector<16x1xf32>
    %126 = vector.broadcast %125 : vector<16x1xf32> to vector<16x32xf32>
    %127 = arith.mulf %122, %126 : vector<16x32xf32>
    %c0_84 = arith.constant 0 : index
    %c0_85 = arith.constant 0 : index
    %128 = vector.load %arg12[%c0_84, %c0_85] : memref<1x32xf32, #tpu.memory_space<vmem>>, vector<1x32xf32>
    %129 = vector.broadcast %128 : vector<1x32xf32> to vector<16x32xf32>
    %130 = arith.mulf %127, %129 : vector<16x32xf32>
    %c0_86 = arith.constant 0 : index
    %c0_87 = arith.constant 0 : index
    %131 = vector.load %arg13[%c0_86, %c0_87] : memref<1x32xf32, #tpu.memory_space<vmem>>, vector<1x32xf32>
    %132 = vector.broadcast %131 : vector<1x32xf32> to vector<16x32xf32>
    %133 = arith.addf %130, %132 : vector<16x32xf32>
    %134 = vector.shape_cast %133 : vector<16x32xf32> to vector<2x8x32xf32>
    %c0_88 = arith.constant 0 : index
    %c0_89 = arith.constant 0 : index
    %c0_90 = arith.constant 0 : index
    %135 = vector.load %arg14[%c0_88, %c0_89, %c0_90] : memref<2x8x32xf32, #tpu.memory_space<vmem>>, vector<2x8x32xf32>
    tpu.vector_store %arg14[%c0_88, %c0_89, %c0_90], %134 {strides = array<i32>} : memref<2x8x32xf32, #tpu.memory_space<vmem>>, vector<2x8x32xf32>,
    return
  }
  func.func @transform_0(%arg0: i32) -> (i32, i32, i32) {
    %c0_i32 = arith.constant 0 : i32
    %c0_i32_0 = arith.constant 0 : i32
    %c0_i32_1 = arith.constant 0 : i32
    return %arg0, %c0_i32, %c0_i32_0 : i32, i32, i32
  }
  func.func @transform_1(%arg0: i32) -> (i32, i32, i32) {
    %c0_i32 = arith.constant 0 : i32
    %c0_i32_0 = arith.constant 0 : i32
    %c0_i32_1 = arith.constant 0 : i32
    return %arg0, %c0_i32, %c0_i32_0 : i32, i32, i32
  }
  func.func @transform_2(%arg0: i32) -> (i32, i32, i32) {
    %c0_i32 = arith.constant 0 : i32
    %c0_i32_0 = arith.constant 0 : i32
    %c0_i32_1 = arith.constant 0 : i32
    return %arg0, %c0_i32, %c0_i32_0 : i32, i32, i32
  }
  func.func @transform_3(%arg0: i32) -> (i32, i32, i32) {
    %c0_i32 = arith.constant 0 : i32
    %c0_i32_0 = arith.constant 0 : i32
    %c0_i32_1 = arith.constant 0 : i32
    %c0_i32_2 = arith.constant 0 : i32
    return %c0_i32, %c0_i32_0, %c0_i32_1 : i32, i32, i32
  }
  func.func @transform_4(%arg0: i32) -> (i32, i32, i32) {
    %c0_i32 = arith.constant 0 : i32
    %c0_i32_0 = arith.constant 0 : i32
    %c0_i32_1 = arith.constant 0 : i32
    %c0_i32_2 = arith.constant 0 : i32
    return %c0_i32, %c0_i32_0, %c0_i32_1 : i32, i32, i32
  }
  func.func @transform_5(%arg0: i32) -> (i32, i32, i32) {
    %c0_i32 = arith.constant 0 : i32
    %c0_i32_0 = arith.constant 0 : i32
    %c0_i32_1 = arith.constant 0 : i32
    %c0_i32_2 = arith.constant 0 : i32
    return %c0_i32, %c0_i32_0, %c0_i32_1 : i32, i32, i32
  }
  func.func @transform_6(%arg0: i32) -> (i32, i32, i32) {
    %c0_i32 = arith.constant 0 : i32
    %c0_i32_0 = arith.constant 0 : i32
    %c0_i32_1 = arith.constant 0 : i32
    %c0_i32_2 = arith.constant 0 : i32
    return %c0_i32, %c0_i32_0, %c0_i32_1 : i32, i32, i32
  }
  func.func @transform_7(%arg0: i32) -> (i32, i32, i32) {
    %c0_i32 = arith.constant 0 : i32
    %c0_i32_0 = arith.constant 0 : i32
    %c0_i32_1 = arith.constant 0 : i32
    %c0_i32_2 = arith.constant 0 : i32
    return %c0_i32, %c0_i32_0, %c0_i32_1 : i32, i32, i32
  }
  func.func @transform_8(%arg0: i32) -> (i32, i32, i32) {
    %c0_i32 = arith.constant 0 : i32
    %c0_i32_0 = arith.constant 0 : i32
    %c0_i32_1 = arith.constant 0 : i32
    %c0_i32_2 = arith.constant 0 : i32
    return %c0_i32, %c0_i32_0, %c0_i32_1 : i32, i32, i32
  }
  func.func @transform_9(%arg0: i32) -> (i32, i32, i32) {
    %c0_i32 = arith.constant 0 : i32
    %c0_i32_0 = arith.constant 0 : i32
    %c0_i32_1 = arith.constant 0 : i32
    %c0_i32_2 = arith.constant 0 : i32
    return %c0_i32, %c0_i32_0, %c0_i32_1 : i32, i32, i32
  }
  func.func @transform_10(%arg0: i32) -> (i32, i32) {
    %c0_i32 = arith.constant 0 : i32
    %c0_i32_0 = arith.constant 0 : i32
    %c0_i32_1 = arith.constant 0 : i32
    return %c0_i32, %c0_i32_0 : i32, i32
  }
  func.func @transform_11(%arg0: i32) -> (i32, i32) {
    %c0_i32 = arith.constant 0 : i32
    %c0_i32_0 = arith.constant 0 : i32
    %c0_i32_1 = arith.constant 0 : i32
    return %c0_i32, %c0_i32_0 : i32, i32
  }
  func.func @transform_12(%arg0: i32) -> (i32, i32) {
    %c0_i32 = arith.constant 0 : i32
    %c0_i32_0 = arith.constant 0 : i32
    %c0_i32_1 = arith.constant 0 : i32
    return %c0_i32, %c0_i32_0 : i32, i32
  }
  func.func @transform_13(%arg0: i32) -> (i32, i32, i32) {
    %c0_i32 = arith.constant 0 : i32
    %c0_i32_0 = arith.constant 0 : i32
    %c0_i32_1 = arith.constant 0 : i32
    return %arg0, %c0_i32, %c0_i32_0 : i32, i32, i32
  }
  func.func @transform_14(%arg0: i32) -> (i32, i32, i32, i32) {
    %c0_i32 = arith.constant 0 : i32
    %c0_i32_0 = arith.constant 0 : i32
    %c0_i32_1 = arith.constant 0 : i32
    %c0_i32_2 = arith.constant 0 : i32
    return %c0_i32, %arg0, %c0_i32_0, %c0_i32_1 : i32, i32, i32, i32
  }
}

</mosaic_0001>

<bundles_post_ra>
// kernel: tpu_custom_call.1
= control target key start
LH: loop header
LB: loop body
LE: loop exit
PB: predicated region body
PF: predicated region fallthrough
CT: control target
= control target key end

     0   :  { %20 = vsyncpa [#allocation3], 0  ;;  %vm69_vm0 = vcmask 261120   ;;  %s2412_s0 = inlined_call_operand.vmem [shape: f32[2,8,32], index: 0, kind: input, shape index: {}]   ;;  %s2413_s1 = inlined_call_operand.vmem [shape: f32[2,16,32], index: 1, kind: input, shape index: {}]   ;;  %s2414_s2 = inlined_call_operand.vmem [shape: f32[2,16,32], index: 2, kind: input, shape index: {}]   ;;  %s2415_s3 = inlined_call_operand.vmem [shape: f32[2,32,16], index: 3, kind: input, shape index: {}]   ;;  %s2416_s4 = inlined_call_operand.vmem [shape: f32[2,1,16], index: 4, kind: input, shape index: {}]   ;;  %s2417_s5 = inlined_call_operand.vmem [shape: f32[2,32,16], index: 5, kind: input, shape index: {}]   ;;  %s2418_s6 = inlined_call_operand.vmem [shape: f32[2,1,16], index: 6, kind: input, shape index: {}]   ;;  %s2419_s7 = inlined_call_operand.vmem [shape: f32[2,32,16], index: 7, kind: input, shape index: {}]   ;;  %s2420_s8 = inlined_call_operand.vmem [shape: f32[2,1,16], index: 8, kind: input, shape index: {}]   ;;  %s2421_s9 = inlined_call_operand.vmem [shape: f32[2,16,32], index: 9, kind: input, shape index: {}]   ;;  %s2422_s10 = inlined_call_operand.vmem [shape: f32[1,32], index: 10, kind: input, shape index: {}]   ;;  %s2423_s11 = inlined_call_operand.vmem [shape: f32[1,32], index: 11, kind: input, shape index: {}]   ;;  %s2424_s12 = inlined_call_operand.vmem [shape: f32[1,32], index: 12, kind: input, shape index: {}]   ;;  %s2425_s13 = inlined_call_operand.hbm [shape: f32[2,8,32], index: 13, kind: output, shape index: {0}]   ;;  %s2426_s14 = inlined_call_operand.hbm [shape: f32[2,2,8,16], index: 14, kind: output, shape index: {1}]  }
   0x1   :  { %v151_v0 = vld [vmem:[%s2417_s5] sm:$0xff]  ;;  %v152_v1 = vld [vmem:[%s2417_s5 + $0x8] sm:$0xff]  ;;  %v153_v2 = vld [vmem:[%s2417_s5 + $0x10] sm:$0xff] }
   0x2   :  { %v1878_v3 = vpack.c.bf16 %v152_v1, %v151_v0  ;;  %v154_v4 = vld [vmem:[%s2417_s5 + $0x18] sm:$0xff]  ;;  %v58_v5 = vld [vmem:[%s2415_s3] sm:$0xff]  ;;  %v59_v6 = vld [vmem:[%s2415_s3 + $0x8] sm:$0xff] }
   0x3   :  { %v1882_v7 = vpack.c.bf16 %v154_v4, %v153_v2  ;;  %v1870_v8 = vpack.c.bf16 %v59_v6, %v58_v5  ;;  %v2134_v9 = vld [vmem:[%s2413_s1] sm:$0xff]  ;;  %v60_v10 = vld [vmem:[%s2415_s3 + $0x10] sm:$0xff]  ;;  %v61_v11 = vld [vmem:[%s2415_s3 + $0x18] sm:$0xff] }
   0x4   :  { %1879 = vmatprep.subr.bf16.mxu1 %v1878_v3  ;;  %1741 = vmatprep.mubr.msk.f32.mxu1 %vm69_vm0, %v2134_v9  ;;  %v1874_v12 = vpack.c.bf16 %v61_v11, %v60_v10  ;;  %v2147_v13 = vld [vmem:[%s2412_s0] sm:$0xff]  ;;  %v260_v15 = vld [vmem:[%s2419_s7 + $0x8] sm:$0xff] }
   0x5   :  { %1881 = vmatpush3.bf16.msra.mxu1 %v1878_v3  ;;  %1871 = vmatprep.subr.bf16.mxu0 %v1870_v8  ;;  %v259_v14 = vld [vmem:[%s2419_s7] sm:$0xff] }
   0x6   :  { %1883 = vmatprep.subr.bf16.mxu1 %v1882_v7  ;;  %1873 = vmatpush3.bf16.msra.mxu0 %v1870_v8 }
   0x7   :  { %21 = vsyncpa [#allocation5], 0  ;;  %1875 = vmatprep.subr.bf16.mxu0 %v1874_v12  ;;  %1730 = vmatprep.mubr.msk.f32.mxu0 %vm69_vm0, %v2147_v13  ;;  %v1886_v16 = vpack.c.bf16 %v260_v15, %v259_v14  ;;  %v2160_v17 = vld [vmem:[%s2413_s1 + $0x8] sm:$0xff]  ;;  %v2165_v18 = vld [vmem:[%s2413_s1 + $0x10] sm:$0xff]  ;;  %v2031_v24 = vmov 0.0|0.0   ;;  %vm2032_vm1 = vmmov 0  }
   0x8   :  { %v2170_v19 = vld [vmem:[%s2412_s0 + $0x8] sm:$0xff]  ;;  %v2179_v20 = vld [vmem:[%s2413_s1 + $0x18] sm:$0xff]  ;;  %v261_v21 = vld [vmem:[%s2419_s7 + $0x10] sm:$0xff]  ;;  %v2033_v29 = vmov 0.0   ;;  %vm369_vm2 = vcmask 130048  }
   0x9   :  { %1885 = vmatpush3.bf16.msra.mxu1 %v1882_v7  ;;  %v262_v22 = vld [vmem:[%s2419_s7 + $0x18] sm:$0xff]  ;;  %v2196_v25 = vld [vmem:[%s2414_s2] sm:$0xff]  ;;  %v2203_v26 = vld [vmem:[%s2414_s2 + $0x8] sm:$0xff] }
   0xa   :  { %1877 = vmatpush3.bf16.msra.mxu0 %v1874_v12  ;;  %v1890_v23 = vpack.c.bf16 %v262_v22, %v261_v21  ;;  %1894 = vmatprep.subr.bf16.mxu1 %v2031_v24  ;;  %v2210_v27 = vld [vmem:[%s2414_s2 + $0x10] sm:$0xff]  ;;  %v2215_v28 = vld [vmem:[%s2414_s2 + $0x18] sm:$0xff]  ;;  %v1583_v30 = vld [vmem:[%s2418_s6] ss:$0 sm:$0xff] }
   0xb   :  { %1887 = vmatprep.subr.bf16.mxu0 %v1886_v16  ;;  %v1580_v36 = vld [vmem:[%s2416_s4] ss:$0 sm:$0xff]  ;;  %vm2233_vm3 = vmpackc.low %vm369_vm2, %vm369_vm2  ;;  %v1602_v14 = vld [vmem:[%s2415_s3 + $0x28] sm:$0xff] }
   0xc   :  { %1742 = vmatmul.mubr.msk.f32.vlgmr.msra.gmra.mrb[0].mxu1 %vm69_vm0, %v2160_v17  ;;  %v1588_v49 = vld [vmem:[%s2420_s8] ss:$0 sm:$0xff]  ;;  %v1604_v21 = vld [vmem:[%s2415_s3 + $0x38] sm:$0xff]  ;;  %v1624_v38 = vld [vmem:[%s2420_s8 + $0x1] ss:$0 sm:$0xff] }
   0xd   :  { %1744 = vmatprep.mubr.msk.f32.mxu1 %vm69_vm0, %v2165_v18  ;;  %1731 = vmatmul.mubr.msk.f32.vlgmr.msra.gmra.mrb[0].mxu0 %vm69_vm0, %v2170_v19 }
   0xe   :  { %1889 = vmatpush3.bf16.msra.mxu0 %v1886_v16  ;;  %1755 = vmatprep.mubr.msk.f32.mxu0 %vm69_vm0, %v2196_v25  ;;  %v1603_v16 = vld [vmem:[%s2415_s3 + $0x30] sm:$0xff] }
   0xf   :  { %1891 = vmatprep.subr.bf16.mxu0 %v1890_v23  ;;  %v1912_v22 = vpack.c.bf16 %v1604_v21, %v1603_v16 }
  0x10   :  { %1745 = vmatmul.mubr.msk.f32.gmra.mrb[2].mxu1 %vm69_vm0, %v2179_v20 }
  0x11   :  { %1765 = vmatprep.mubr.msk.f32.mxu1 %vm2032_vm1, %v2033_v29 }
  0x12   :  { %1893 = vmatpush3.bf16.msra.mxu0 %v1890_v23 }
  0x13   :  { %1898 = vmatprep.subr.bf16.mxu0 %v2031_v24 }
  0x15   :  { %1756 = vmatmul.mubr.msk.f32.vlgmr.msra.gmra.mrb[2].mxu0 %vm69_vm0, %v2203_v26 }
  0x16   :  { %1758 = vmatprep.mubr.msk.f32.mxu0 %vm69_vm0, %v2210_v27 }
  0x19   :  { %1759 = vmatmul.mubr.msk.f32.gmra.mrb[4].mxu0 %vm69_vm0, %v2215_v28 }
  0x1a   :  { %1772 = vmatprep.mubr.msk.f32.mxu0 %vm2032_vm1, %v2033_v29 }
  0xdf   :  { %v1743_v31 = vpop.f32.mrb[0].mxu1 }
  0xe0   :  { %v246_v32 = vadd.f32 %v1743_v31, %v1583_v30  ;;  %v240_v33 = vpop.f32.mrb[1].mxu1  ;;  %v1732_v34 = vpop.f32.mrb[0].mxu0 }
  0xe1   :  { %v241_v35 = vadd.f32 %v1583_v30, %v240_v33  ;;  %v142_v37 = vpop.f32.mrb[1].mxu0  ;;  %v148_v47 = vadd.f32 %v1732_v34, %v1580_v36 }
  0xe2   :  { %v143_v43 = vadd.f32 %v1580_v36, %v142_v37  ;;  %v1610_v36 = vld [vmem:[%s2417_s5 + $0x28] sm:$0xff] }
  0xe3   :  { %v1895_v39 = vpack.c.bf16 %v246_v32, %v241_v35  ;;  %v1746_v40 = vpop.f32.mrb[2].mxu1  ;;  %v368_v48 = vmul.f32 0.25, %v148_v47  ;;  %v1609_v35 = vld [vmem:[%s2417_s5 + $0x20] sm:$0xff] }
  0xe4   :  { %v256_v41 = vadd.f32 %v1746_v40, %v1583_v30  ;;  %v250_v42 = vpop.f32.mrb[3].mxu1  ;;  %v367_v46 = vmul.f32 0.25, %v143_v43  ;;  %v1916_v40 = vpack.c.bf16 %v1610_v36, %v1609_v35 }
  0xe5   :  { %v251_v44 = vadd.f32 %v1583_v30, %v250_v42  ;;  %1897 = vmatpush3.bf16.xpose.msk.msra.mxu1 %vm2233_vm3, %v1895_v39  ;;  %v1612_v42 = vld [vmem:[%s2417_s5 + $0x38] sm:$0xff] }
  0xe6   :  { %1902 = vmatprep.subr.bf16.mxu1 %v2031_v24 }
  0xe7   :  { %v1899_v45 = vpack.c.bf16 %v256_v41, %v251_v44  ;;  %v1611_v41 = vld [vmem:[%s2417_s5 + $0x30] sm:$0xff] }
  0xe8   :  { %v1757_v50 = vpop.f32.mrb[2].mxu0 }
  0xe9   :  { %1901 = vmatpush3.bf16.xpose.msk.msra.mxu0 %vm2233_vm3, %v1899_v45  ;;  %v354_v51 = vadd.f32 %v1757_v50, %v1588_v49  ;;  %v348_v52 = vpop.f32.mrb[3].mxu0  ;;  %v1920_v45 = vpack.c.bf16 %v1612_v42, %v1611_v41 }
  0xea   :  { %v349_v53 = vadd.f32 %v1588_v49, %v348_v52 }
  0xec   :  { %1766 = vmatmul.mubr.msk.f32.vlgmr.msra.gmra.mrb[4].mxu1 %vm369_vm2, %v367_v46  ;;  %v1903_v54 = vpack.c.bf16 %v354_v51, %v349_v53  ;;  %v1760_v55 = vpop.f32.mrb[4].mxu0  ;;  %v1620_v46 = vld [vmem:[%s2419_s7 + $0x28] sm:$0xff] }
  0xed   :  { %1779 = vmatprep.mubr.msk.f32.mxu1 %vm2032_vm1, %v2033_v29  ;;  %v364_v56 = vadd.f32 %v1760_v55, %v1588_v49  ;;  %v358_v57 = vpop.f32.mrb[5].mxu0 }
  0xee   :  { %v359_v58 = vadd.f32 %v1588_v49, %v358_v57  ;;  %1904 = vmatpush3.bf16.msra.mxu1 %v1903_v54  ;;  %v1614_v54 = vld [vmem:[%s2418_s6 + $0x1] ss:$0 sm:$0xff] }
  0xef   :  { %1905 = vmatprep.subr.bf16.mxu1 %v2031_v24  ;;  %v1606_v57 = vld [vmem:[%s2416_s4 + $0x1] ss:$0 sm:$0xff] }
  0xf0   :  { %1773 = vmatmul.mubr.msk.f32.vlgmr.msra.gmra.mrb[6].mxu0 %vm369_vm2, %v368_v48  ;;  %v1906_v59 = vpack.c.bf16 %v364_v56, %v359_v58 }
  0xf1   :  { %1797 = vmatprep.mubr.msk.f32.mxu0 %vm69_vm0, %v2147_v13  ;;  %v1601_v13 = vld [vmem:[%s2415_s3 + $0x20] sm:$0xff] }
  0xf2   :  { %v1908_v15 = vpack.c.bf16 %v1602_v14, %v1601_v13 }
  0xf4   :  { %1909 = vmatprep.subr.bf16.mxu0 %v1908_v15 }
  0xf5   :  { %1911 = vmatpush3.bf16.msra.mxu0 %v1908_v15 }
  0xf6   :  { %1913 = vmatprep.subr.bf16.mxu0 %v1912_v22 }
  0xf9   :  { %1915 = vmatpush3.bf16.msra.mxu0 %v1912_v22 }
  0xfc   :  { %1798 = vmatmul.mubr.msk.f32.vlgmr.msra.gmra.mrb[8].mxu0 %vm69_vm0, %v2170_v19 }
  0xfd   :  { %1822 = vmatprep.mubr.msk.f32.mxu0 %vm69_vm0, %v2196_v25 }
 0x1bf   :  { %v445_v60 = vpop.f32.mrb[4].mxu1 }
 0x1c0   :  { %528 = vst.msk [vmem:[#allocation4] sm:$0xff] %vm369_vm2, %v445_v60  ;;  %v1767_v61 = vpop.f32.mrb[5].mxu1  ;;  %v530_v62 = vsel %vm369_vm2, %v445_v60, -inf }
 0x1c1   :  { %531 = vmax.xlane.f32.xlu0 %v530_v62 }
 0x1c3   :  { %v524_v63 = vpop.f32.mrb[6].mxu0 }
 0x1c4   :  { %529 = vst.msk [vmem:[#allocation4 + $0x8] sm:$0xff] %vm369_vm2, %v524_v63  ;;  %v1774_v0 = vpop.f32.mrb[7].mxu0  ;;  %v533_v1 = vsel %vm369_vm2, %v524_v63, -inf }
 0x1c5   :  { %534 = vmax.xlane.f32.xlu0 %v533_v1 }
 0x1cf   :  { %v1799_v48 = vpop.f32.mrb[8].mxu0 }
 0x1d0   :  { %v785_v49 = vpop.f32.mrb[9].mxu0 }
 0x24e   :  { %v532_v2 = vpop.xlane.xlu0 %531 }
 0x24f   :  { %v536_v3 = vsub.f32 %v445_v60, %v532_v2  ;;  %v705_v60 = vld [vmem:[%s2421_s9 + $0x8] sm:$0xff] }
 0x251   :  { %v538_v4 = vmul.f32 1.442695, %v536_v3 }
 0x252   :  { %v535_v5 = vpop.xlane.xlu0 %534 }
 0x253   :  { %1963 = vpow2.f32 %v538_v4  ;;  %v537_v6 = vsub.f32 %v524_v63, %v535_v5  ;;  %v786_v63 = vadd.f32 %v1606_v57, %v785_v49  ;;  %v791_v4 = vadd.f32 %v1799_v48, %v1606_v57 }
 0x255   :  { %v540_v7 = vmul.f32 1.442695, %v537_v6  ;;  %v990_v3 = vmul.f32 0.25, %v786_v63  ;;  %v991_v5 = vmul.f32 0.25, %v791_v4 }
 0x257   :  { %1965 = vpow2.f32 %v540_v7 }
 0x25d   :  { %v1964_v8 = vpop.eup %1963 }
 0x25e   :  { %v542_v10 = vsel %vm369_vm2, %v1964_v8, 0.0 }
 0x25f   :  { %543 = vadd.xlane.f32.xlu1 %v542_v10 }
 0x261   :  { %v1966_v11 = vpop.eup %1965 }
 0x262   :  { %v545_v12 = vsel %vm369_vm2, %v1966_v11, 0.0 }
 0x263   :  { %546 = vadd.xlane.f32.xlu1 %v545_v12 }
 0x2ec   :  { %v544_v23 = vpop.xlane.xlu1 %543 }
 0x2ed   :  { %1967 = vrcp.f32 %v544_v23 }
 0x2f0   :  { %v547_v30 = vpop.xlane.xlu1 %546 }
 0x2f1   :  { %1969 = vrcp.f32 %v547_v30 }
 0x2f7   :  { %v1968_v31 = vpop.eup %1967 }
 0x2f8   :  { %v550_v32 = vmul.f32 %v1968_v31, %v544_v23 }
 0x2fa   :  { %v552_v33 = vsub.f32 2.0, %v550_v32 }
 0x2fb   :  { %v1970_v34 = vpop.eup %1969 }
 0x2fc   :  { %v554_v19 = vmul.f32 %v1968_v31, %v552_v33  ;;  %v551_v37 = vmul.f32 %v1970_v34, %v547_v30 }
 0x2fe   :  { %v556_v39 = vmul.f32 %v1964_v8, %v554_v19  ;;  %v553_v25 = vsub.f32 2.0, %v551_v37 }
 0x300   :  { %v555_v43 = vmul.f32 %v1970_v34, %v553_v25  ;;  %1780 = vmatmul.mubr.msk.f32.vlgmr.msra.gmra.mrb[6].mxu1 %vm369_vm2, %v556_v39 }
 0x301   :  { %1907 = vmatpush3.bf16.msra.mxu1 %v1906_v59  ;;  %1786 = vmatprep.mubr.msk.f32.mxu1 %vm2032_vm1, %v2033_v29  ;;  %v704_v59 = vld [vmem:[%s2421_s9] sm:$0xff] }
 0x302   :  { %v557_v44 = vmul.f32 %v1966_v11, %v555_v43  ;;  %1917 = vmatprep.subr.bf16.mxu1 %v1916_v40  ;;  %v1950_v1 = vpack.c.bf16 %v705_v60, %v704_v59 }
 0x304   :  { %1787 = vmatmul.mubr.msk.f32.vlgmr.msra.gmra.mrb[8].mxu1 %vm369_vm2, %v557_v44 }
 0x305   :  { %1919 = vmatpush3.bf16.msra.mxu1 %v1916_v40  ;;  %1808 = vmatprep.mubr.msk.f32.mxu1 %vm69_vm0, %v2134_v9  ;;  %v1619_v9 = vld [vmem:[%s2419_s7 + $0x20] sm:$0xff] }
 0x306   :  { %1921 = vmatprep.subr.bf16.mxu1 %v1920_v45  ;;  %v1924_v47 = vpack.c.bf16 %v1620_v46, %v1619_v9 }
 0x308   :  { %1925 = vmatprep.subr.bf16.mxu0 %v1924_v47 }
 0x309   :  { %1923 = vmatpush3.bf16.msra.mxu1 %v1920_v45  ;;  %1927 = vmatpush3.bf16.msra.mxu0 %v1924_v47 }
 0x30a   :  { %1932 = vmatprep.subr.bf16.mxu1 %v2031_v24 }
 0x30c   :  { %1809 = vmatmul.mubr.msk.f32.vlgmr.msra.gmra.mrb[10].mxu1 %vm69_vm0, %v2160_v17  ;;  %v1621_v17 = vld [vmem:[%s2419_s7 + $0x30] sm:$0xff] }
 0x30d   :  { %1811 = vmatprep.mubr.msk.f32.mxu1 %vm69_vm0, %v2165_v18  ;;  %v1622_v18 = vld [vmem:[%s2419_s7 + $0x38] sm:$0xff] }
 0x310   :  { %1812 = vmatmul.mubr.msk.f32.gmra.mrb[12].mxu1 %vm69_vm0, %v2179_v20  ;;  %v1928_v20 = vpack.c.bf16 %v1622_v18, %v1621_v17 }
 0x311   :  { %1832 = vmatprep.mubr.msk.f32.mxu1 %vm2032_vm1, %v2033_v29 }
 0x312   :  { %1929 = vmatprep.subr.bf16.mxu0 %v1928_v20 }
 0x313   :  { %1931 = vmatpush3.bf16.msra.mxu0 %v1928_v20 }
 0x314   :  { %1936 = vmatprep.subr.bf16.mxu0 %v2031_v24 }
 0x316   :  { %1823 = vmatmul.mubr.msk.f32.vlgmr.msra.gmra.mrb[10].mxu0 %vm69_vm0, %v2203_v26 }
 0x317   :  { %1825 = vmatprep.mubr.msk.f32.mxu0 %vm69_vm0, %v2210_v27 }
 0x31a   :  { %1826 = vmatmul.mubr.msk.f32.gmra.mrb[12].mxu0 %vm69_vm0, %v2215_v28 }
 0x31b   :  { %1839 = vmatprep.mubr.msk.f32.mxu0 %vm2032_vm1, %v2033_v29 }
 0x3d3   :  { %v627_v50 = vpop.f32.mrb[6].mxu1 }
 0x3d4   :  { %v1781_v51 = vpop.f32.mrb[7].mxu1 }
 0x3d5   :  { %v1637_v51 = vld [vmem:[%s2421_s9 + $0x10] sm:$0xff] }
 0x3d7   :  { %v700_v52 = vpop.f32.mrb[8].mxu1 }
 0x3d8   :  { %v1788_v53 = vpop.f32.mrb[9].mxu1 }
 0x3df   :  { %v1810_v26 = vpop.f32.mrb[10].mxu1 }
 0x3e0   :  { %v879_v55 = vadd.f32 %v1810_v26, %v1614_v54  ;;  %v873_v56 = vpop.f32.mrb[11].mxu1 }
 0x3e1   :  { %v874_v27 = vadd.f32 %v1614_v54, %v873_v56 }
 0x3e3   :  { %v1933_v28 = vpack.c.bf16 %v879_v55, %v874_v27  ;;  %v1813_v58 = vpop.f32.mrb[12].mxu1  ;;  %v1643_v27 = vld [vmem:[%s2422_s10] ss:$0 sm:$0xff] }
 0x3e4   :  { %v889_v61 = vadd.f32 %v1813_v58, %v1614_v54  ;;  %v883_v62 = vpop.f32.mrb[13].mxu1 }
 0x3e5   :  { %v884_v0 = vadd.f32 %v1614_v54, %v883_v62  ;;  %1935 = vmatpush3.bf16.xpose.msk.msra.mxu1 %vm2233_vm3, %v1933_v28 }
 0x3e6   :  { %1940 = vmatprep.subr.bf16.mxu1 %v2031_v24 }
 0x3e7   :  { %v1937_v2 = vpack.c.bf16 %v889_v61, %v884_v0 }
 0x3e9   :  { %1939 = vmatpush3.bf16.xpose.msk.msra.mxu0 %vm2233_vm3, %v1937_v2  ;;  %v1824_v6 = vpop.f32.mrb[10].mxu0 }
 0x3ea   :  { %1951 = vmatprep.subr.bf16.mxu0 %v1950_v1  ;;  %v977_v7 = vadd.f32 %v1824_v6, %v1624_v38  ;;  %v971_v8 = vpop.f32.mrb[11].mxu0 }
 0x3eb   :  { %v972_v10 = vadd.f32 %v1624_v38, %v971_v8 }
 0x3ec   :  { %1833 = vmatmul.mubr.msk.f32.vlgmr.msra.gmra.mrb[14].mxu1 %vm369_vm2, %v990_v3 }
 0x3ed   :  { %1846 = vmatprep.mubr.msk.f32.mxu1 %vm2032_vm1, %v2033_v29  ;;  %v1941_v11 = vpack.c.bf16 %v977_v7, %v972_v10  ;;  %v1827_v12 = vpop.f32.mrb[12].mxu0 }
 0x3ee   :  { %v987_v13 = vadd.f32 %v1827_v12, %v1624_v38  ;;  %v981_v14 = vpop.f32.mrb[13].mxu0 }
 0x3ef   :  { %1942 = vmatpush3.bf16.msra.mxu1 %v1941_v11  ;;  %v982_v15 = vadd.f32 %v1624_v38, %v981_v14 }
 0x3f0   :  { %1840 = vmatmul.mubr.msk.f32.vlgmr.msra.gmra.mrb[14].mxu0 %vm369_vm2, %v991_v5  ;;  %1943 = vmatprep.subr.bf16.mxu1 %v2031_v24 }
 0x3f1   :  { %1953 = vmatpush3.bf16.msra.mxu0 %v1950_v1  ;;  %1867 = vmatprep.mubr.msk.f32.mxu0 %vm369_vm2, %v627_v50  ;;  %v1944_v16 = vpack.c.bf16 %v987_v13, %v982_v15 }
 0x3f4   :  { %1868 = vmatmul.mubr.msk.f32.vlgmr.msra.gmra.mrb[16].mxu0 %vm369_vm2, %v700_v52  ;;  %v1638_v52 = vld [vmem:[%s2421_s9 + $0x18] sm:$0xff]  ;;  %s2034_s9 = smov [#allocation4]  }
 0x3f5   :  { %v1946_v53 = vpack.c.bf16 %v1638_v52, %v1637_v51  ;;  %s1565_s10 = sshll.u32 %s2034_s9, 4  ;;  %s1566_s10 = int_to_ptr.vmem [resolvable:$true] %s1565_s10 }
 0x3f6   :  { %s1983_s24 = scalar_lea.vmem %s1566_s10, 512  ;;  %p1988_p1 = scmp.lt.s32.totalorder %s1566_s10, %s1566_s10 }
 0x3f7   :  { %p1984_p0 = scmp.ne.s32.totalorder %s1566_s10, %s1983_s24  ;;  %p1989_p2 = scmp.lt.s32.totalorder %s1983_s24, %s1983_s24 }
 0x3f9   :  { %p1990_p3 = por %p1989_p2, %p1988_p1 }
 0x3fb   :  { %p1991_p4 = pnand %p1990_p3, %p1984_p0 }
 0x4bf   :  { %v1067_v21 = vpop.f32.mrb[14].mxu1 }
 0x4c0   :  { %1151 = vst.msk [vmem:[#allocation4 + $0x10] sm:$0xff] %vm369_vm2, %v1067_v21  ;;  %v1834_v22 = vpop.f32.mrb[15].mxu1  ;;  %v1153_v23 = vsel %vm369_vm2, %v1067_v21, -inf }
 0x4c1   :  { %1154 = vmax.xlane.f32.xlu0 %v1153_v23 }
 0x4c3   :  { %v1146_v30 = vpop.f32.mrb[14].mxu0 }
 0x4c4   :  { %1152 = vst.msk [vmem:[#allocation4 + $0x18] sm:$0xff] %vm369_vm2, %v1146_v30  ;;  %v1841_v31 = vpop.f32.mrb[15].mxu0  ;;  %v1156_v32 = vsel %vm369_vm2, %v1146_v30, -inf }
 0x4c5   :  { %1157 = vmax.xlane.f32.xlu1 %v1156_v32 }
 0x4c7   :  { %v1869_v33 = vpop.f32.mrb[16].mxu0 }
 0x4c8   :  { %v1483_v34 = vpop.f32.mrb[17].mxu0 }
 0x54e   :  { %v1155_v24 = vpop.xlane.xlu0 %1154 }
 0x54f   :  { %v1159_v35 = vsub.f32 %v1067_v21, %v1155_v24 }
 0x551   :  { %v1161_v36 = vmul.f32 1.442695, %v1159_v35 }
 0x552   :  { %v1158_v19 = vpop.xlane.xlu1 %1157 }
 0x553   :  { %1971 = vpow2.f32 %v1161_v36  ;;  %v1160_v37 = vsub.f32 %v1146_v30, %v1158_v19 }
 0x555   :  { %v1163_v39 = vmul.f32 1.442695, %v1160_v37 }
 0x557   :  { %1973 = vpow2.f32 %v1163_v39 }
 0x55d   :  { %v1972_v25 = vpop.eup %1971 }
 0x55e   :  { %v1165_v40 = vsel %vm369_vm2, %v1972_v25, 0.0 }
 0x55f   :  { %1166 = vadd.xlane.f32.xlu0 %v1165_v40 }
 0x561   :  { %v1974_v41 = vpop.eup %1973 }
 0x562   :  { %v1168_v42 = vsel %vm369_vm2, %v1974_v41, 0.0 }
 0x563   :  { %1169 = vadd.xlane.f32.xlu1 %v1168_v42 }
 0x5ec   :  { %v1167_v43 = vpop.xlane.xlu0 %1166 }
 0x5ed   :  { %1975 = vrcp.f32 %v1167_v43 }
 0x5f0   :  { %v1170_v44 = vpop.xlane.xlu1 %1169 }
 0x5f1   :  { %1977 = vrcp.f32 %v1170_v44 }
 0x5f7   :  { %v1976_v45 = vpop.eup %1975 }
 0x5f8   :  { %v1173_v9 = vmul.f32 %v1976_v45, %v1167_v43 }
 0x5fa   :  { %v1175_v46 = vsub.f32 2.0, %v1173_v9 }
 0x5fb   :  { %v1978_v47 = vpop.eup %1977 }
 0x5fc   :  { %v1177_v17 = vmul.f32 %v1976_v45, %v1175_v46  ;;  %v1174_v18 = vmul.f32 %v1978_v47, %v1170_v44 }
 0x5fe   :  { %v1179_v20 = vmul.f32 %v1972_v25, %v1177_v17  ;;  %v1176_v48 = vsub.f32 2.0, %v1174_v18 }
 0x600   :  { %v1178_v49 = vmul.f32 %v1978_v47, %v1176_v48  ;;  %1847 = vmatmul.mubr.msk.f32.vlgmr.msra.gmra.mrb[16].mxu1 %vm369_vm2, %v1179_v20 }
 0x601   :  { %1945 = vmatpush3.bf16.msra.mxu1 %v1944_v16  ;;  %1853 = vmatprep.mubr.msk.f32.mxu1 %vm2032_vm1, %v2033_v29 }
 0x602   :  { %v1180_v50 = vmul.f32 %v1974_v41, %v1178_v49  ;;  %1947 = vmatprep.subr.bf16.mxu1 %v1946_v53 }
 0x604   :  { %1854 = vmatmul.mubr.msk.f32.vlgmr.msra.gmra.mrb[18].mxu1 %vm369_vm2, %v1180_v50 }
 0x605   :  { %1949 = vmatpush3.bf16.msra.mxu1 %v1946_v53 }
 0x6d3   :  { %v1250_v54 = vpop.f32.mrb[16].mxu1 }
 0x6d4   :  { %v1848_v26 = vpop.f32.mrb[17].mxu1  ;;  %1860 = vmatprep.mubr.msk.f32.mxu1 %vm369_vm2, %v1250_v54 }
 0x6d7   :  { %v1323_v55 = vpop.f32.mrb[18].mxu1 }
 0x6d8   :  { %v1855_v29 = vpop.f32.mrb[19].mxu1  ;;  %1861 = vmatmul.mubr.msk.f32.vlgmr.msra.gmra.mrb[20].mxu1 %vm369_vm2, %v1323_v55 }
 0x7ab   :  { %v1862_v56 = vpop.f32.mrb[20].mxu1 }
 0x7ac   :  { %v1489_v57 = vadd.f32 %v1869_v33, %v1862_v56  ;;  %v1402_v28 = vpop.f32.mrb[21].mxu1 }
 0x7ad   :  { %v1484_v58 = vadd.f32 %v1483_v34, %v1402_v28 }
 0x7ae   :  { %v1500_v59 = vadd.f32 %v1643_v27, %v1489_v57 }
 0x7af   :  { %v1499_v60 = vadd.f32 %v1643_v27, %v1484_v58 }
 0x7b0   :  { %v1504_v61 = vsel %vm69_vm0, %v1500_v59, 0.0 }
 0x7b1   :  { %1505 = vadd.xlane.f32.xlu1 %v1504_v61  ;;  %v1501_v62 = vsel %vm69_vm0, %v1499_v60, 0.0 }
 0x7b2   :  { %1502 = vadd.xlane.f32.xlu0 %v1501_v62 }
 0x83e   :  { %v1506_v63 = vpop.xlane.xlu1 %1505 }
 0x83f   :  { %v1509_v0 = vmul.f32 0.03125, %v1506_v63  ;;  %v1503_v1 = vpop.xlane.xlu0 %1502 }
 0x840   :  { %v1508_v2 = vmul.f32 0.03125, %v1503_v1 }
 0x841   :  { %v1511_v3 = vsub.f32 %v1500_v59, %v1509_v0 }
 0x842   :  { %v1510_v4 = vsub.f32 %v1499_v60, %v1508_v2 }
 0x843   :  { %v1513_v5 = vmul.f32 %v1511_v3, %v1511_v3 }
 0x844   :  { %v1512_v38 = vmul.f32 %v1510_v4, %v1510_v4 }
 0x845   :  { %v1517_v6 = vsel %vm69_vm0, %v1513_v5, 0.0 }
 0x846   :  { %1518 = vadd.xlane.f32.xlu1 %v1517_v6  ;;  %v1514_v7 = vsel %vm69_vm0, %v1512_v38, 0.0 }
 0x847   :  { %1515 = vadd.xlane.f32.xlu0 %v1514_v7 }
 0x848   :  { %1994 = shalt.err (!%p1991_p4)
}
 0x849   :  { %s1995_s25 = scalar_lea.hbm %s2426_s14, 512 }
 0x84a   :  { %p1996_p5 = scmp.ne.s32.totalorder %s2426_s14, %s1995_s25  ;;  %p1999_p6 = scmp.lt.u32.totalorder %s1995_s25, %s2426_s14 }
 0x84c   :  { %p2001_p7 = pnand %p1999_p6, %p1996_p5 }
 0x84e   :  { %2004 = shalt.err (!%p2001_p7)
}
 0x84f   :  { %s2035_s29 = smov 128   ;;  %s2036_s7 = smov 8   ;;  %v1644_v16 = vld [vmem:[%s2423_s11] ss:$0 sm:$0xff] }
 0x850   :  { %1571 = dma.vmem_to_hbm [thread:$0]  %s1566_s10, 512, %s2426_s14, [#allocation5], %s2035_s29, %s2035_s29, %s2036_s7  }
 0x851   :  { %v1645_v30 = vld [vmem:[%s2424_s12] ss:$0 sm:$0xff]  ;;  %s2037_s14 = smov [#allocation2]  }
 0x852   :  { %s1553_s19 = sshll.u32 %s2037_s14, 4  ;;  %s1554_s19 = int_to_ptr.vmem [resolvable:$true] %s1553_s19 }
 0x853   :  { %s2005_s4 = scalar_lea.vmem %s1554_s19, 256  ;;  %p2010_p9 = scmp.lt.s32.totalorder %s1554_s19, %s1554_s19 }
 0x854   :  { %p2006_p8 = scmp.ne.s32.totalorder %s1554_s19, %s2005_s4  ;;  %p2011_p10 = scmp.lt.s32.totalorder %s2005_s4, %s2005_s4 }
 0x856   :  { %p2012_p11 = por %p2011_p10, %p2010_p9 }
 0x858   :  { %p2013_p12 = pnand %p2012_p11, %p2006_p8 }
 0x8d3   :  { %v1519_v8 = vpop.xlane.xlu1 %1518 }
 0x8d4   :  { %v1521_v10 = vmul.f32 0.03125, %v1519_v8  ;;  %v1516_v11 = vpop.xlane.xlu0 %1515 }
 0x8d5   :  { %v1520_v12 = vmul.f32 0.03125, %v1516_v11 }
 0x8d6   :  { %v1523_v13 = vadd.f32 1e-06, %v1521_v10 }
 0x8d7   :  { %v1522_v14 = vadd.f32 1e-06, %v1520_v12 }
 0x8d8   :  { %1979 = vrsqrt.f32 %v1523_v13 }
 0x8d9   :  { %1981 = vrsqrt.f32 %v1522_v14 }
 0x8e2   :  { %v1980_v15 = vpop.eup %1979 }
 0x8e3   :  { %v1982_v21 = vpop.eup %1981  ;;  %v1527_v22 = vmul.f32 %v1980_v15, %v1511_v3 }
 0x8e4   :  { %v1526_v23 = vmul.f32 %v1982_v21, %v1510_v4 }
 0x8e5   :  { %v1536_v31 = vmul.f32 %v1644_v16, %v1527_v22 }
 0x8e6   :  { %v1535_v32 = vmul.f32 %v1644_v16, %v1526_v23 }
 0x8e7   :  { %v1545_v33 = vadd.f32 %v1645_v30, %v1536_v31 }
 0x8e8   :  { %v1544_v34 = vadd.f32 %v1645_v30, %v1535_v32 }
 0x8e9   :  { %1547 = vst.msk [vmem:[#allocation2 + $0x8] sm:$0xff] %vm69_vm0, %v1545_v33 }
 0x8ea   :  { %1546 = vst.msk [vmem:[#allocation2] sm:$0xff] %vm69_vm0, %v1544_v34 }
 0x8eb   :  { %2016 = shalt.err (!%p2013_p12)
}
 0x8ec   :  { %s2017_s6 = scalar_lea.hbm %s2425_s13, 256 }
 0x8ed   :  { %p2018_p13 = scmp.ne.s32.totalorder %s2425_s13, %s2017_s6  ;;  %p2021_p0 = scmp.lt.u32.totalorder %s2017_s6, %s2425_s13 }
 0x8ef   :  { %p2023_p1 = pnand %p2021_p0, %p2018_p13 }
 0x8f1   :  { %2026 = shalt.err (!%p2023_p1)
}
 0x8f2   :  { %1559 = dma.vmem_to_hbm [thread:$0]  %s1554_s19, 256, %s2425_s13, [#allocation3], %s2035_s29, %s2035_s29, %s2036_s7  }
 0x8f3   :  { %2027 = dma.done.wait [#allocation3], 256  }
 0x8f4   :  { %2028 = vsyncadd [#allocation3], 4294967040 }
 0x8f5   :  { %2029 = dma.done.wait [#allocation5], 512  }
 0x8f6   :  { %2030 = vsyncadd [#allocation5], 4294966784 }
 0x8f7   :  { %1578 = vsyncpa [#allocation3], 1 }
 0x8f8   :  { %1579 = vsyncpa [#allocation5], 1 }

</bundles_post_ra>
